<compile_context>
chip_gen: v7x
topology: tpu7x:2x2x1
jax: 0.10.0
libtpu: 0.0.40
codegen_flags: <defaults>
</compile_context>

<pallas_src>
import jax
import jax.numpy as jnp
from jax.experimental import pallas as pl
from jax.experimental.pallas import tpu as pltpu


def _round_up(n: int, m: int) -> int:
    return ((n + m - 1) // m) * m


def _choose_tile_rows(batch, input_dim, hidden_dim, output_dim, relation_dim):
    """Batch tile: multiple of 8 sublanes, >=2 tiles for v7x megacore, VMEM-capped."""
    if batch < 16:
        return _round_up(max(batch, 1), 8)
    # At least two grid tiles so ("parallel",) shards the batch across v7x's two
    # TensorCores (single TC on v5e/v6e: extra steps only cost ~0.35us each).
    tb = _round_up((batch + 1) // 2, 8)
    # Double-buffered streamed bytes/row (bf16 x, f32 ||x||^2, two f32 outputs)
    stream = 2 * (2 * input_dim + 4 + 2 * 4 * output_dim)
    # f32 temporaries/row (h1, hi/lo splits, features, relation activations).
    temps = 4 * (3 * hidden_dim + 3 * output_dim + relation_dim)
    budget = 36 * 1024 * 1024  # safe inside v7x's 64 MiB; v5e/v6e have 128 MiB
    cap = max(8, (budget // (stream + temps)) // 8 * 8)
    return int(min(tb, 512, cap))


def _split_bf16(a):
    """Split an f32 array into bf16 hi + lo planes (hi + lo ~= a to ~16 bits)."""
    hi = a.astype(jnp.bfloat16)
    lo = (a - hi.astype(jnp.float32)).astype(jnp.bfloat16)
    return hi, lo


def _dual_gaussian_kernel(x_ref, xsq_ref, a1hi_ref, a1lo_ref, g1_ref,
                          a2hi_ref, a2lo_ref, g2_ref,
                          w1t_ref, b1_ref, w2t_ref, b2_ref,
                          feat_ref, enh_ref):
    """One batch tile: Gaussian1 -> Gaussian2 -> Linear -> ReLU -> Linear."""
    x = x_ref[...]                                   # [TB, IN] bf16 (streamed)
    x_sq = xsq_ref[...]                              # [TB, 1]  f32 exact ||x||^2

    # --- GaussianLayer 1: exp(-||x - c||^2 / s^2) ---------------------------
    # exponent = -||x||^2/s^2 - ||c||^2/s^2 + (2/s^2) x.c ; cross term on the
    # MXU in bf16 with the c-side split hi+lo (only x carries bf16 rounding).
    cross1 = (jnp.dot(x, a1hi_ref[...], preferred_element_type=jnp.float32)
              + jnp.dot(x, a1lo_ref[...], preferred_element_type=jnp.float32))
    e1 = x_sq * g1_ref[0:1, :] + g1_ref[1:2, :] + cross1
    h1 = jnp.exp(jnp.minimum(e1, 0.0))               # [TB, H] f32

    # --- GaussianLayer 2 (K = hidden is small: bf16x3 split, near-f32 exact) -
    h1_sq = jnp.sum(h1 * h1, axis=-1, keepdims=True)  # exact f32 ||h1||^2
    h1_hi = h1.astype(jnp.bfloat16)
    h1_lo = (h1 - h1_hi.astype(jnp.float32)).astype(jnp.bfloat16)
    cross2 = (jnp.dot(h1_hi, a2hi_ref[...], preferred_element_type=jnp.float32)
              + jnp.dot(h1_lo, a2hi_ref[...], preferred_element_type=jnp.float32)
              + jnp.dot(h1_hi, a2lo_ref[...], preferred_element_type=jnp.float32))
    e2 = h1_sq * g2_ref[0:1, :] + g2_ref[1:2, :] + cross2
    features = jnp.exp(jnp.minimum(e2, 0.0))          # [TB, O] f32

    # --- RelationModule: Linear -> ReLU -> Linear (bf16 MXU, f32 accumulate) -
    r = jnp.dot(features.astype(jnp.bfloat16), w1t_ref[...],
                preferred_element_type=jnp.float32) + b1_ref[...]
    r = jnp.maximum(r, 0.0)
    enhanced = jnp.dot(r.astype(jnp.bfloat16), w2t_ref[...],
                       preferred_element_type=jnp.float32) + b2_ref[...]

    feat_ref[...] = features.astype(feat_ref.dtype)
    enh_ref[...] = enhanced.astype(enh_ref.dtype)


@jax.jit
def dual_gaussian_forward(x, params):
    """x: NCHW (or any) array; flattened to [B, -1] like torch's x.view(B, -1)."""
    c1, s1, c2, s2, w1, b1, w2, b2 = params

    B = x.shape[0]
    xf = x.reshape(B, -1).astype(jnp.float32)
    input_dim = xf.shape[1]
    hidden_dim = c1.shape[0]
    output_dim = c2.shape[0]
    relation_dim = w1.shape[0]

    TB = _choose_tile_rows(B, input_dim, hidden_dim, output_dim, relation_dim)
    B_pad = _round_up(B, TB)

    # Hoisted exact ||x||^2 (f32) + bf16 x stream (halves the dominant HBM read).
    x_sq = jnp.sum(xf * xf, axis=-1, keepdims=True)            # [B, 1] f32
    x_bf = xf.astype(jnp.bfloat16)                             # [B, IN] bf16
    if B_pad != B:
        pad = ((0, B_pad - B), (0, 0))
        x_bf = jnp.pad(x_bf, pad)
        x_sq = jnp.pad(x_sq, pad)
    num_tiles = B_pad // TB

    # --- hoisted constants: fold 1/sigma^2 into the centre matrices ----------
    c1f = c1.astype(jnp.float32)
    c2f = c2.astype(jnp.float32)
    s1f = s1.astype(jnp.float32)
    s2f = s2.astype(jnp.float32)
    nis1 = -1.0 / (s1f * s1f)                                   # [H]
    nis2 = -1.0 / (s2f * s2f)                                   # [O]
    a1 = (c1f * (-2.0 * nis1)[:, None]).T                       # [IN, H] = 2*c1^T/s1^2
    a2 = (c2f * (-2.0 * nis2)[:, None]).T                       # [H,  O] = 2*c2^T/s2^2
    a1_hi, a1_lo = _split_bf16(a1)
    a2_hi, a2_lo = _split_bf16(a2)
    g1 = jnp.stack([nis1, nis1 * jnp.sum(c1f * c1f, axis=-1)])  # [2, H] f32
    g2 = jnp.stack([nis2, nis2 * jnp.sum(c2f * c2f, axis=-1)])  # [2, O] f32
    w1_t = w1.T.astype(jnp.bfloat16)                            # [O, R]
    w2_t = w2.T.astype(jnp.bfloat16)                            # [R, O]
    b1r = b1.astype(jnp.float32)[None, :]                       # [1, R]
    b2r = b2.astype(jnp.float32)[None, :]                       # [1, O]

    def batch_spec(cols):
        return pl.BlockSpec((TB, cols), lambda i: (i, 0))

    def resident_spec(arr):
        return pl.BlockSpec(arr.shape, lambda i: (0, 0))

    # VMEM budget: double-buffered streams + default double-buffered residents
    # + f32 temporaries, with headroom; capped well below v7x's 64 MiB.
    resident_bytes = (2 * (a1_hi.size + a1_lo.size + a2_hi.size + a2_lo.size
                           + w1_t.size + w2_t.size) * 2
                      + 4 * (g1.size + g2.size + b1r.size + b2r.size) * 2)
    stream_bytes = 2 * TB * (2 * input_dim + 4 + 2 * 4 * output_dim)
    temp_bytes = 4 * TB * (3 * hidden_dim + 3 * output_dim + relation_dim)
    vmem_limit = int(min(max(2 * (resident_bytes + stream_bytes + temp_bytes),
                             16 * 1024 * 1024), 48 * 1024 * 1024))

    out_shape = (
        jax.ShapeDtypeStruct((B_pad, output_dim), jnp.float32),  # features
        jax.ShapeDtypeStruct((B_pad, output_dim), jnp.float32),  # enhanced_features
    )

    feat, enh = pl.pallas_call(
        _dual_gaussian_kernel,
        out_shape=out_shape,
        grid=(num_tiles,),
        in_specs=[
            batch_spec(input_dim),   # x (bf16)
            batch_spec(1),           # ||x||^2 (f32)
            resident_spec(a1_hi), resident_spec(a1_lo), resident_spec(g1),
            resident_spec(a2_hi), resident_spec(a2_lo), resident_spec(g2),
            resident_spec(w1_t), resident_spec(b1r),
            resident_spec(w2_t), resident_spec(b2r),
        ],
        out_specs=(batch_spec(output_dim), batch_spec(output_dim)),
        compiler_params=pltpu.CompilerParams(
            dimension_semantics=("parallel",),
            vmem_limit_bytes=vmem_limit,
        ),
    )(x_bf, x_sq, a1_hi, a1_lo, g1, a2_hi, a2_lo, g2, w1_t, b1r, w2_t, b2r)

    return feat[:B], enh[:B]


def init_params(key, input_dim, hidden_dim, output_dim, relation_hidden_dim):
    """Deterministic parameter init mirroring the torch module's shapes/init."""
    k1, k2, k3, k4, k5, k6 = jax.random.split(key, 6)

    # GaussianLayer 1 / 2: centres ~ U(-1, 1), sigmas = 1 (torch default)
    c1 = jax.random.uniform(k1, (hidden_dim, input_dim), jnp.float32, -1.0, 1.0)
    s1 = jnp.ones((hidden_dim,), jnp.float32)
    c2 = jax.random.uniform(k2, (output_dim, hidden_dim), jnp.float32, -1.0, 1.0)
    s2 = jnp.ones((output_dim,), jnp.float32)

    # RelationModule linears: torch default ~ U(-1/sqrt(fan_in), 1/sqrt(fan_in))
    bnd1 = 1.0 / (output_dim ** 0.5)
    w1 = jax.random.uniform(k3, (relation_hidden_dim, output_dim), jnp.float32, -bnd1, bnd1)
    b1 = jax.random.uniform(k4, (relation_hidden_dim,), jnp.float32, -bnd1, bnd1)
    bnd2 = 1.0 / (relation_hidden_dim ** 0.5)
    w2 = jax.random.uniform(k5, (output_dim, relation_hidden_dim), jnp.float32, -bnd2, bnd2)
    b2 = jax.random.uniform(k6, (output_dim,), jnp.float32, -bnd2, bnd2)
    return (c1, s1, c2, s2, w1, b1, w2, b2)


def _reference_forward(x, params):
    """Pure-JAX f32 reference matching the torch semantics exactly."""
    c1, s1, c2, s2, w1, b1, w2, b2 = params
    xf = x.reshape(x.shape[0], -1).astype(jnp.float32)

    def gaussian(inp, centres, sigmas):
        diff = inp[:, None, :] - centres[None, :, :]
        dist = jnp.sqrt(jnp.sum(diff * diff, axis=-1)) / sigmas[None, :]
        return jnp.exp(-(dist ** 2))

    h1 = gaussian(xf, c1, s1)
    feat = gaussian(h1, c2, s2)
    r = jnp.maximum(feat @ w1.T + b1, 0.0)
    enh = r @ w2.T + b2
    return feat, enh


if __name__ == "__main__":
    # Small shapes: NCHW input [2, 4, 16, 16] -> flattened input_dim = 1024
    B, C, H, W = 2, 4, 16, 16
    input_dim = C * H * W        # 1024
    hidden_dim = 128
    output_dim = 128
    relation_hidden_dim = 128

    key = jax.random.PRNGKey(0)
    kx, kp = jax.random.split(key)
    x = jax.random.normal(kx, (B, C, H, W), jnp.float32)
    c1, s1, c2, s2, w1, b1, w2, b2 = init_params(
        kp, input_dim, hidden_dim, output_dim, relation_hidden_dim)

    # Torch's default sigma=1 drives exp(-d2) into deep underflow at input_dim=1024,
    # which would make the precision assertions vacuous.  Use realistic bandwidths
    # so features are non-degenerate and the bf16 MXU path is actually exercised.
    s1 = jnp.full_like(s1, (2.0 * input_dim) ** 0.5 / 1.2)   # exponent ~ -1
    s2 = jnp.full_like(s2, 8.0)                              # exponent ~ -1
    params = (c1, s1, c2, s2, w1, b1, w2, b2)

    features, enhanced = dual_gaussian_forward(x, params)
    jax.block_until_ready((features, enhanced))

    ref_feat, ref_enh = _reference_forward(x, params)
    assert features.shape == (B, output_dim) and enhanced.shape == (B, output_dim)
    assert bool(jnp.all(jnp.isfinite(features))) and bool(jnp.all(jnp.isfinite(enhanced)))
    # Gaussian path: exact f32 norms + c-side-split bf16 cross terms -> tight tolerance.
    assert jnp.allclose(features, ref_feat, atol=1e-4, rtol=1e-4), \
        float(jnp.max(jnp.abs(features - ref_feat)))
    # Relation module uses bf16 MXU operands (f32 accumulate) -> looser tolerance.
    assert jnp.allclose(enhanced, ref_enh, atol=1e-2, rtol=1e-2), \
        float(jnp.max(jnp.abs(enhanced - ref_enh)))

    print("KERNEL_OK")
</pallas_src>

<mosaic_0001>
module attributes {stable_mosaic.version = 11 : i64} {
  func.func @_dual_gaussian_kernel(%arg0: i32, %arg1: memref<8x1024xbf16, #tpu.memory_space<vmem>>, %arg2: memref<8x1xf32, #tpu.memory_space<vmem>>, %arg3: memref<1024x128xbf16, #tpu.memory_space<vmem>>, %arg4: memref<1024x128xbf16, #tpu.memory_space<vmem>>, %arg5: memref<2x128xf32, #tpu.memory_space<vmem>>, %arg6: memref<128x128xbf16, #tpu.memory_space<vmem>>, %arg7: memref<128x128xbf16, #tpu.memory_space<vmem>>, %arg8: memref<2x128xf32, #tpu.memory_space<vmem>>, %arg9: memref<128x128xbf16, #tpu.memory_space<vmem>>, %arg10: memref<1x128xf32, #tpu.memory_space<vmem>>, %arg11: memref<128x128xbf16, #tpu.memory_space<vmem>>, %arg12: memref<1x128xf32, #tpu.memory_space<vmem>>, %arg13: memref<8x128xf32, #tpu.memory_space<vmem>>, %arg14: memref<8x128xf32, #tpu.memory_space<vmem>>) attributes {dimension_semantics = [#tpu.dimension_semantics<parallel>], iteration_bounds = array<i64: 1>, scalar_prefetch = 0 : i64, scratch_operands = 0 : i64, tpu.core_type = #tpu.core_type<tc>, window_params = [{transform_indices = @transform_0, window_bounds = array<i64: 8, 1024>}, {transform_indices = @transform_1, window_bounds = array<i64: 8, 1>}, {pipeline_mode = #tpu.pipeline_mode<synchronous>, transform_indices = @transform_2, window_bounds = array<i64: 1024, 128>}, {pipeline_mode = #tpu.pipeline_mode<synchronous>, transform_indices = @transform_3, window_bounds = array<i64: 1024, 128>}, {pipeline_mode = #tpu.pipeline_mode<synchronous>, transform_indices = @transform_4, window_bounds = array<i64: 2, 128>}, {pipeline_mode = #tpu.pipeline_mode<synchronous>, transform_indices = @transform_5, window_bounds = array<i64: 128, 128>}, {pipeline_mode = #tpu.pipeline_mode<synchronous>, transform_indices = @transform_6, window_bounds = array<i64: 128, 128>}, {pipeline_mode = #tpu.pipeline_mode<synchronous>, transform_indices = @transform_7, window_bounds = array<i64: 2, 128>}, {pipeline_mode = #tpu.pipeline_mode<synchronous>, transform_indices = @transform_8, window_bounds = array<i64: 128, 128>}, {pipeline_mode = #tpu.pipeline_mode<synchronous>, transform_indices = @transform_9, window_bounds = array<i64: 1, 128>}, {pipeline_mode = #tpu.pipeline_mode<synchronous>, transform_indices = @transform_10, window_bounds = array<i64: 128, 128>}, {pipeline_mode = #tpu.pipeline_mode<synchronous>, transform_indices = @transform_11, window_bounds = array<i64: 1, 128>}, {transform_indices = @transform_12, window_bounds = array<i64: 8, 128>}, {transform_indices = @transform_13, window_bounds = array<i64: 8, 128>}]} {
    %c0 = arith.constant 0 : index
    %c0_0 = arith.constant 0 : index
    %0 = vector.load %arg1[%c0, %c0_0] : memref<8x1024xbf16, #tpu.memory_space<vmem>>, vector<8x1024xbf16>
    %c0_1 = arith.constant 0 : index
    %c0_2 = arith.constant 0 : index
    %1 = vector.load %arg2[%c0_1, %c0_2] : memref<8x1xf32, #tpu.memory_space<vmem>>, vector<8x1xf32>
    %c0_3 = arith.constant 0 : index
    %c0_4 = arith.constant 0 : index
    %2 = vector.load %arg3[%c0_3, %c0_4] : memref<1024x128xbf16, #tpu.memory_space<vmem>>, vector<1024x128xbf16>
    %cst = arith.constant dense<0.000000e+00> : vector<8x128xf32>
    %3 = tpu.matmul %0, %2, %cst {dimension_numbers = #tpu.dot_dimension_numbers<[1], [0], [0], [1], [0, 0, 1, 1], [], []>} : vector<8x1024xbf16>, vector<1024x128xbf16>, vector<8x128xf32> -> vector<8x128xf32>
    %c0_5 = arith.constant 0 : index
    %c0_6 = arith.constant 0 : index
    %4 = vector.load %arg4[%c0_5, %c0_6] : memref<1024x128xbf16, #tpu.memory_space<vmem>>, vector<1024x128xbf16>
    %cst_7 = arith.constant dense<0.000000e+00> : vector<8x128xf32>
    %5 = tpu.matmul %0, %4, %cst_7 {dimension_numbers = #tpu.dot_dimension_numbers<[1], [0], [0], [1], [0, 0, 1, 1], [], []>} : vector<8x1024xbf16>, vector<1024x128xbf16>, vector<8x128xf32> -> vector<8x128xf32>
    %6 = arith.addf %3, %5 : vector<8x128xf32>
    %c0_8 = arith.constant 0 : index
    %c0_9 = arith.constant 0 : index
    %7 = vector.load %arg5[%c0_8, %c0_9] : memref<2x128xf32, #tpu.memory_space<vmem>>, vector<1x128xf32>
    %8 = vector.broadcast %1 : vector<8x1xf32> to vector<8x128xf32>
    %9 = vector.broadcast %7 : vector<1x128xf32> to vector<8x128xf32>
    %10 = arith.mulf %8, %9 : vector<8x128xf32>
    %c1 = arith.constant 1 : index
    %c0_10 = arith.constant 0 : index
    %11 = vector.load %arg5[%c1, %c0_10] : memref<2x128xf32, #tpu.memory_space<vmem>>, vector<1x128xf32>
    %12 = vector.broadcast %11 : vector<1x128xf32> to vector<8x128xf32>
    %13 = arith.addf %10, %12 : vector<8x128xf32>
    %14 = arith.addf %13, %6 : vector<8x128xf32>
    %cst_11 = arith.constant 0.000000e+00 : f32
    %15 = vector.broadcast %cst_11 : f32 to vector<8x128xf32>
    %16 = arith.minimumf %14, %15 : vector<8x128xf32>
    %17 = math.exp %16 : vector<8x128xf32>
    %18 = arith.mulf %17, %17 : vector<8x128xf32>
    %cst_12 = arith.constant dense<0.000000e+00> : vector<8xf32>
    %19 = vector.multi_reduction <add>, %18, %cst_12 [1] : vector<8x128xf32> to vector<8xf32>
    %20 = vector.shape_cast %19 : vector<8xf32> to vector<8x1xf32>
    %21 = arith.truncf %17 : vector<8x128xf32> to vector<8x128xbf16>
    %22 = arith.extf %21 : vector<8x128xbf16> to vector<8x128xf32>
    %23 = arith.subf %17, %22 : vector<8x128xf32>
    %24 = arith.truncf %23 : vector<8x128xf32> to vector<8x128xbf16>
    %c0_13 = arith.constant 0 : index
    %c0_14 = arith.constant 0 : index
    %25 = vector.load %arg6[%c0_13, %c0_14] : memref<128x128xbf16, #tpu.memory_space<vmem>>, vector<128x128xbf16>
    %cst_15 = arith.constant dense<0.000000e+00> : vector<8x128xf32>
    %26 = tpu.matmul %21, %25, %cst_15 {dimension_numbers = #tpu.dot_dimension_numbers<[1], [0], [0], [1], [0, 0, 1, 1], [], []>} : vector<8x128xbf16>, vector<128x128xbf16>, vector<8x128xf32> -> vector<8x128xf32>
    %c0_16 = arith.constant 0 : index
    %c0_17 = arith.constant 0 : index
    %27 = vector.load %arg6[%c0_16, %c0_17] : memref<128x128xbf16, #tpu.memory_space<vmem>>, vector<128x128xbf16>
    %cst_18 = arith.constant dense<0.000000e+00> : vector<8x128xf32>
    %28 = tpu.matmul %24, %27, %cst_18 {dimension_numbers = #tpu.dot_dimension_numbers<[1], [0], [0], [1], [0, 0, 1, 1], [], []>} : vector<8x128xbf16>, vector<128x128xbf16>, vector<8x128xf32> -> vector<8x128xf32>
    %29 = arith.addf %26, %28 : vector<8x128xf32>
    %c0_19 = arith.constant 0 : index
    %c0_20 = arith.constant 0 : index
    %30 = vector.load %arg7[%c0_19, %c0_20] : memref<128x128xbf16, #tpu.memory_space<vmem>>, vector<128x128xbf16>
    %cst_21 = arith.constant dense<0.000000e+00> : vector<8x128xf32>
    %31 = tpu.matmul %21, %30, %cst_21 {dimension_numbers = #tpu.dot_dimension_numbers<[1], [0], [0], [1], [0, 0, 1, 1], [], []>} : vector<8x128xbf16>, vector<128x128xbf16>, vector<8x128xf32> -> vector<8x128xf32>
    %32 = arith.addf %29, %31 : vector<8x128xf32>
    %c0_22 = arith.constant 0 : index
    %c0_23 = arith.constant 0 : index
    %33 = vector.load %arg8[%c0_22, %c0_23] : memref<2x128xf32, #tpu.memory_space<vmem>>, vector<1x128xf32>
    %34 = vector.broadcast %20 : vector<8x1xf32> to vector<8x128xf32>
    %35 = vector.broadcast %33 : vector<1x128xf32> to vector<8x128xf32>
    %36 = arith.mulf %34, %35 : vector<8x128xf32>
    %c1_24 = arith.constant 1 : index
    %c0_25 = arith.constant 0 : index
    %37 = vector.load %arg8[%c1_24, %c0_25] : memref<2x128xf32, #tpu.memory_space<vmem>>, vector<1x128xf32>
    %38 = vector.broadcast %37 : vector<1x128xf32> to vector<8x128xf32>
    %39 = arith.addf %36, %38 : vector<8x128xf32>
    %40 = arith.addf %39, %32 : vector<8x128xf32>
    %cst_26 = arith.constant 0.000000e+00 : f32
    %41 = vector.broadcast %cst_26 : f32 to vector<8x128xf32>
    %42 = arith.minimumf %40, %41 : vector<8x128xf32>
    %43 = math.exp %42 : vector<8x128xf32>
    %44 = arith.truncf %43 : vector<8x128xf32> to vector<8x128xbf16>
    %c0_27 = arith.constant 0 : index
    %c0_28 = arith.constant 0 : index
    %45 = vector.load %arg9[%c0_27, %c0_28] : memref<128x128xbf16, #tpu.memory_space<vmem>>, vector<128x128xbf16>
    %cst_29 = arith.constant dense<0.000000e+00> : vector<8x128xf32>
    %46 = tpu.matmul %44, %45, %cst_29 {dimension_numbers = #tpu.dot_dimension_numbers<[1], [0], [0], [1], [0, 0, 1, 1], [], []>} : vector<8x128xbf16>, vector<128x128xbf16>, vector<8x128xf32> -> vector<8x128xf32>
    %c0_30 = arith.constant 0 : index
    %c0_31 = arith.constant 0 : index
    %47 = vector.load %arg10[%c0_30, %c0_31] : memref<1x128xf32, #tpu.memory_space<vmem>>, vector<1x128xf32>
    %48 = vector.broadcast %47 : vector<1x128xf32> to vector<8x128xf32>
    %49 = arith.addf %46, %48 : vector<8x128xf32>
    %cst_32 = arith.constant 0.000000e+00 : f32
    %50 = vector.broadcast %cst_32 : f32 to vector<8x128xf32>
    %51 = arith.maximumf %49, %50 : vector<8x128xf32>
    %52 = arith.truncf %51 : vector<8x128xf32> to vector<8x128xbf16>
    %c0_33 = arith.constant 0 : index
    %c0_34 = arith.constant 0 : index
    %53 = vector.load %arg11[%c0_33, %c0_34] : memref<128x128xbf16, #tpu.memory_space<vmem>>, vector<128x128xbf16>
    %cst_35 = arith.constant dense<0.000000e+00> : vector<8x128xf32>
    %54 = tpu.matmul %52, %53, %cst_35 {dimension_numbers = #tpu.dot_dimension_numbers<[1], [0], [0], [1], [0, 0, 1, 1], [], []>} : vector<8x128xbf16>, vector<128x128xbf16>, vector<8x128xf32> -> vector<8x128xf32>
    %c0_36 = arith.constant 0 : index
    %c0_37 = arith.constant 0 : index
    %55 = vector.load %arg12[%c0_36, %c0_37] : memref<1x128xf32, #tpu.memory_space<vmem>>, vector<1x128xf32>
    %56 = vector.broadcast %55 : vector<1x128xf32> to vector<8x128xf32>
    %57 = arith.addf %54, %56 : vector<8x128xf32>
    %c0_38 = arith.constant 0 : index
    %c0_39 = arith.constant 0 : index
    %58 = vector.load %arg13[%c0_38, %c0_39] : memref<8x128xf32, #tpu.memory_space<vmem>>, vector<8x128xf32>
    tpu.vector_store %arg13[%c0_38, %c0_39], %43 {strides = array<i32>} : memref<8x128xf32, #tpu.memory_space<vmem>>, vector<8x128xf32>,
    %c0_40 = arith.constant 0 : index
    %c0_41 = arith.constant 0 : index
    %59 = vector.load %arg14[%c0_40, %c0_41] : memref<8x128xf32, #tpu.memory_space<vmem>>, vector<8x128xf32>
    tpu.vector_store %arg14[%c0_40, %c0_41], %57 {strides = array<i32>} : memref<8x128xf32, #tpu.memory_space<vmem>>, vector<8x128xf32>,
    return
  }
  func.func @transform_0(%arg0: i32) -> (i32, i32) {
    %c0_i32 = arith.constant 0 : i32
    %c0_i32_0 = arith.constant 0 : i32
    return %arg0, %c0_i32 : i32, i32
  }
  func.func @transform_1(%arg0: i32) -> (i32, i32) {
    %c0_i32 = arith.constant 0 : i32
    %c0_i32_0 = arith.constant 0 : i32
    return %arg0, %c0_i32 : i32, i32
  }
  func.func @transform_2(%arg0: i32) -> (i32, i32) {
    %c0_i32 = arith.constant 0 : i32
    %c0_i32_0 = arith.constant 0 : i32
    %c0_i32_1 = arith.constant 0 : i32
    return %c0_i32, %c0_i32_0 : i32, i32
  }
  func.func @transform_3(%arg0: i32) -> (i32, i32) {
    %c0_i32 = arith.constant 0 : i32
    %c0_i32_0 = arith.constant 0 : i32
    %c0_i32_1 = arith.constant 0 : i32
    return %c0_i32, %c0_i32_0 : i32, i32
  }
  func.func @transform_4(%arg0: i32) -> (i32, i32) {
    %c0_i32 = arith.constant 0 : i32
    %c0_i32_0 = arith.constant 0 : i32
    %c0_i32_1 = arith.constant 0 : i32
    return %c0_i32, %c0_i32_0 : i32, i32
  }
  func.func @transform_5(%arg0: i32) -> (i32, i32) {
    %c0_i32 = arith.constant 0 : i32
    %c0_i32_0 = arith.constant 0 : i32
    %c0_i32_1 = arith.constant 0 : i32
    return %c0_i32, %c0_i32_0 : i32, i32
  }
  func.func @transform_6(%arg0: i32) -> (i32, i32) {
    %c0_i32 = arith.constant 0 : i32
    %c0_i32_0 = arith.constant 0 : i32
    %c0_i32_1 = arith.constant 0 : i32
    return %c0_i32, %c0_i32_0 : i32, i32
  }
  func.func @transform_7(%arg0: i32) -> (i32, i32) {
    %c0_i32 = arith.constant 0 : i32
    %c0_i32_0 = arith.constant 0 : i32
    %c0_i32_1 = arith.constant 0 : i32
    return %c0_i32, %c0_i32_0 : i32, i32
  }
  func.func @transform_8(%arg0: i32) -> (i32, i32) {
    %c0_i32 = arith.constant 0 : i32
    %c0_i32_0 = arith.constant 0 : i32
    %c0_i32_1 = arith.constant 0 : i32
    return %c0_i32, %c0_i32_0 : i32, i32
  }
  func.func @transform_9(%arg0: i32) -> (i32, i32) {
    %c0_i32 = arith.constant 0 : i32
    %c0_i32_0 = arith.constant 0 : i32
    %c0_i32_1 = arith.constant 0 : i32
    return %c0_i32, %c0_i32_0 : i32, i32
  }
  func.func @transform_10(%arg0: i32) -> (i32, i32) {
    %c0_i32 = arith.constant 0 : i32
    %c0_i32_0 = arith.constant 0 : i32
    %c0_i32_1 = arith.constant 0 : i32
    return %c0_i32, %c0_i32_0 : i32, i32
  }
  func.func @transform_11(%arg0: i32) -> (i32, i32) {
    %c0_i32 = arith.constant 0 : i32
    %c0_i32_0 = arith.constant 0 : i32
    %c0_i32_1 = arith.constant 0 : i32
    return %c0_i32, %c0_i32_0 : i32, i32
  }
  func.func @transform_12(%arg0: i32) -> (i32, i32) {
    %c0_i32 = arith.constant 0 : i32
    %c0_i32_0 = arith.constant 0 : i32
    return %arg0, %c0_i32 : i32, i32
  }
  func.func @transform_13(%arg0: i32) -> (i32, i32) {
    %c0_i32 = arith.constant 0 : i32
    %c0_i32_0 = arith.constant 0 : i32
    return %arg0, %c0_i32 : i32, i32
  }
}

</mosaic_0001>

<bundles_post_ra>
// kernel: dual_gaussian_forward.1
= control target key start
LH: loop header
LB: loop body
LE: loop exit
PB: predicated region body
PF: predicated region fallthrough
CT: control target
= control target key end

     0   :  { %v2620_v8 = vmov 0   ;;  %vm2622_vm0 = vmmov 0   ;;  %s3294_s3 = inlined_call_operand.vmem [shape: bf16[1024,128], index: 3, kind: input, shape index: {}]   ;;  %s3295_s0 = inlined_call_operand.vmem [shape: bf16[8,1024], index: 0, kind: input, shape index: {}]   ;;  %s3296_s2 = inlined_call_operand.vmem [shape: bf16[1024,128], index: 2, kind: input, shape index: {}]   ;;  %s3297_s1 = inlined_call_operand.vmem [shape: f32[8,1], index: 1, kind: input, shape index: {}]   ;;  %s3298_s5 = inlined_call_operand.vmem [shape: bf16[128,128], index: 5, kind: input, shape index: {}]   ;;  %s3299_s6 = inlined_call_operand.vmem [shape: bf16[128,128], index: 6, kind: input, shape index: {}]   ;;  %s3300_s4 = inlined_call_operand.vmem [shape: f32[2,128], index: 4, kind: input, shape index: {}]   ;;  %s3301_s8 = inlined_call_operand.vmem [shape: bf16[128,128], index: 8, kind: input, shape index: {}]   ;;  %s3302_s10 = inlined_call_operand.vmem [shape: bf16[128,128], index: 10, kind: input, shape index: {}]   ;;  %s3303_s7 = inlined_call_operand.vmem [shape: f32[2,128], index: 7, kind: input, shape index: {}]   ;;  %s3304_s12 = inlined_call_operand.vmem [shape: f32[8,128], index: 12, kind: output, shape index: {0}]   ;;  %s3305_s9 = inlined_call_operand.vmem [shape: f32[1,128], index: 9, kind: input, shape index: {}]   ;;  %s3306_s11 = inlined_call_operand.vmem [shape: f32[1,128], index: 11, kind: input, shape index: {}]   ;;  %s3307_s13 = inlined_call_operand.vmem [shape: f32[8,128], index: 13, kind: output, shape index: {1}]  }
   0x1   :  { %v2448_v0 = vld [vmem:[%s3294_s3 + $0x40] sm:$0xff]   ;;  %v2452_v4 = vld [vmem:[%s3294_s3 + $0x48] sm:$0xff]   ;;  %2447 = vset.pattern.permute.xlu0 %v2620_v8  ;;  %v2456_v9 = vld [vmem:[%s3294_s3 + $0x50] sm:$0xff]  }
   0x2   :  { %v2449_v1 = vld [vmem:[%s3294_s3 + $0xc0] sm:$0xff]   ;;  %2123 = vmatprep.subr.bf16.mxu0 %v2448_v0  ;;  %v2453_v5 = vld [vmem:[%s3294_s3 + $0xc8] sm:$0xff]   ;;  %v2457_v10 = vld [vmem:[%s3294_s3 + $0xd0] sm:$0xff]  }
   0x3   :  { %v2450_v2 = vld [vmem:[%s3294_s3] sm:$0xff]   ;;  %2145 = vmatprep.subr.bf16.mxu1 %v2449_v1  ;;  %v2454_v6 = vld [vmem:[%s3294_s3 + $0x8] sm:$0xff]   ;;  %v2458_v11 = vld [vmem:[%s3294_s3 + $0x10] sm:$0xff]  }
   0x4   :  { %v2451_v3 = vld [vmem:[%s3294_s3 + $0x80] sm:$0xff]   ;;  %2124 = vmatpush3.bf16.msra.mxu0 %v2450_v2  ;;  %v2455_v7 = vld [vmem:[%s3294_s3 + $0x88] sm:$0xff]   ;;  %v2459_v12 = vld [vmem:[%s3294_s3 + $0x90] sm:$0xff]  }
   0x5   :  { %2146 = vmatpush3.bf16.msra.mxu1 %v2451_v3  ;;  %2125 = vmatprep.subr.bf16.mxu0 %v2452_v4  ;;  %v2460_v13 = vld [vmem:[%s3294_s3 + $0x58] sm:$0xff]   ;;  %v2464_v17 = vld [vmem:[%s3294_s3 + $0x60] sm:$0xff]   ;;  %v2468_v21 = vld [vmem:[%s3294_s3 + $0x68] sm:$0xff]  }
   0x6   :  { %2147 = vmatprep.subr.bf16.mxu1 %v2453_v5  ;;  %v2461_v14 = vld [vmem:[%s3294_s3 + $0xd8] sm:$0xff]   ;;  %v2465_v18 = vld [vmem:[%s3294_s3 + $0xe0] sm:$0xff]   ;;  %v2469_v22 = vld [vmem:[%s3294_s3 + $0xe8] sm:$0xff]  }
   0x7   :  { %v2462_v15 = vld [vmem:[%s3294_s3 + $0x18] sm:$0xff]   ;;  %v2466_v19 = vld [vmem:[%s3294_s3 + $0x20] sm:$0xff]   ;;  %v2470_v23 = vld [vmem:[%s3294_s3 + $0x28] sm:$0xff]  }
   0x8   :  { %2126 = vmatpush3.bf16.msra.mxu0 %v2454_v6  ;;  %v2463_v16 = vld [vmem:[%s3294_s3 + $0x98] sm:$0xff]   ;;  %v2467_v20 = vld [vmem:[%s3294_s3 + $0xa0] sm:$0xff]   ;;  %v2471_v24 = vld [vmem:[%s3294_s3 + $0xa8] sm:$0xff]  }
   0x9   :  { %2148 = vmatpush3.bf16.msra.mxu1 %v2455_v7  ;;  %2127 = vmatprep.subr.bf16.mxu0 %v2456_v9  ;;  %v2472_v25 = vld [vmem:[%s3294_s3 + $0x70] sm:$0xff]   ;;  %v2476_v29 = vld [vmem:[%s3294_s3 + $0x78] sm:$0xff]   ;;  %v44_v33 = vld [vmem:[%s3295_s0] sm:$0xff] }
   0xa   :  { %2149 = vmatprep.subr.bf16.mxu1 %v2457_v10  ;;  %v2473_v26 = vld [vmem:[%s3294_s3 + $0xf0] sm:$0xff]   ;;  %v2477_v30 = vld [vmem:[%s3294_s3 + $0xf8] sm:$0xff]   ;;  %v45_v34 = vld [vmem:[%s3295_s0 + $0x8] sm:$0xff]  ;;  %v2795_v35 = vcombine.low %v44_v33, %v44_v33  ;;  %v2797_v36 = vcombine.high %v44_v33, %v44_v33 }
   0xb   :  { %v2474_v27 = vld [vmem:[%s3294_s3 + $0x30] sm:$0xff]   ;;  %v2478_v31 = vld [vmem:[%s3294_s3 + $0x38] sm:$0xff]   ;;  %v2799_v37 = vcombine.low %v45_v34, %v45_v34  ;;  %v2801_v38 = vcombine.high %v45_v34, %v45_v34  ;;  %v2484_v39 = vld [vmem:[%s3294_s3 + $0x140] sm:$0xff]  }
   0xc   :  { %2128 = vmatpush3.bf16.msra.mxu0 %v2458_v11  ;;  %v2475_v28 = vld [vmem:[%s3294_s3 + $0xb0] sm:$0xff]   ;;  %v2479_v32 = vld [vmem:[%s3294_s3 + $0xb8] sm:$0xff]   ;;  %v2485_v40 = vld [vmem:[%s3294_s3 + $0x1c0] sm:$0xff]   ;;  %749 = vmatprep.mubr.bf16.mxu0 %v2797_v36 }
   0xd   :  { %2150 = vmatpush3.bf16.msra.mxu1 %v2459_v12  ;;  %2129 = vmatprep.subr.bf16.mxu0 %v2460_v13  ;;  %v2486_v41 = vld [vmem:[%s3294_s3 + $0x100] sm:$0xff]   ;;  %v2488_v43 = vld [vmem:[%s3294_s3 + $0x148] sm:$0xff]   ;;  %v2492_v47 = vld [vmem:[%s3294_s3 + $0x150] sm:$0xff]  }
   0xe   :  { %2151 = vmatprep.subr.bf16.mxu1 %v2461_v14  ;;  %789 = vmatprep.mubr.bf16.mxu1 %v2801_v38  ;;  %v2487_v42 = vld [vmem:[%s3294_s3 + $0x180] sm:$0xff]   ;;  %v2489_v44 = vld [vmem:[%s3294_s3 + $0x1c8] sm:$0xff]   ;;  %v2493_v48 = vld [vmem:[%s3294_s3 + $0x1d0] sm:$0xff]  }
   0xf   :  { %v2490_v45 = vld [vmem:[%s3294_s3 + $0x108] sm:$0xff]   ;;  %v2494_v49 = vld [vmem:[%s3294_s3 + $0x110] sm:$0xff]   ;;  %v2496_v51 = vld [vmem:[%s3294_s3 + $0x158] sm:$0xff]  }
  0x10   :  { %2130 = vmatpush3.bf16.msra.mxu0 %v2462_v15  ;;  %v2491_v46 = vld [vmem:[%s3294_s3 + $0x188] sm:$0xff]   ;;  %v2495_v50 = vld [vmem:[%s3294_s3 + $0x190] sm:$0xff]   ;;  %v2497_v52 = vld [vmem:[%s3294_s3 + $0x1d8] sm:$0xff]  }
  0x11   :  { %2152 = vmatpush3.bf16.msra.mxu1 %v2463_v16  ;;  %2131 = vmatprep.subr.bf16.mxu0 %v2464_v17  ;;  %v2498_v53 = vld [vmem:[%s3294_s3 + $0x118] sm:$0xff]   ;;  %v2500_v55 = vld [vmem:[%s3294_s3 + $0x160] sm:$0xff]   ;;  %v2504_v59 = vld [vmem:[%s3294_s3 + $0x168] sm:$0xff]  }
  0x12   :  { %2153 = vmatprep.subr.bf16.mxu1 %v2465_v18  ;;  %v2499_v54 = vld [vmem:[%s3294_s3 + $0x198] sm:$0xff]   ;;  %v2501_v56 = vld [vmem:[%s3294_s3 + $0x1e0] sm:$0xff]   ;;  %v2505_v60 = vld [vmem:[%s3294_s3 + $0x1e8] sm:$0xff]  }
  0x13   :  { %v2502_v57 = vld [vmem:[%s3294_s3 + $0x120] sm:$0xff]   ;;  %v2506_v61 = vld [vmem:[%s3294_s3 + $0x128] sm:$0xff]   ;;  %v2508_v63 = vld [vmem:[%s3294_s3 + $0x170] sm:$0xff]  }
  0x14   :  { %2132 = vmatpush3.bf16.msra.mxu0 %v2466_v19  ;;  %v2503_v58 = vld [vmem:[%s3294_s3 + $0x1a0] sm:$0xff]   ;;  %v2507_v62 = vld [vmem:[%s3294_s3 + $0x1a8] sm:$0xff]   ;;  %v2509_v0 = vld [vmem:[%s3294_s3 + $0x1f0] sm:$0xff]  }
  0x15   :  { %2154 = vmatpush3.bf16.msra.mxu1 %v2467_v20  ;;  %2133 = vmatprep.subr.bf16.mxu0 %v2468_v21  ;;  %v2510_v1 = vld [vmem:[%s3294_s3 + $0x130] sm:$0xff]   ;;  %v2512_v3 = vld [vmem:[%s3294_s3 + $0x178] sm:$0xff]   ;;  %v2520_v13 = vld [vmem:[%s3296_s2 + $0x40] sm:$0xff]  }
  0x16   :  { %2155 = vmatprep.subr.bf16.mxu1 %v2469_v22  ;;  %v2511_v2 = vld [vmem:[%s3294_s3 + $0x1b0] sm:$0xff]   ;;  %v2513_v4 = vld [vmem:[%s3294_s3 + $0x1f8] sm:$0xff]   ;;  %v2521_v14 = vld [vmem:[%s3296_s2 + $0xc0] sm:$0xff]  }
  0x17   :  { %v2514_v5 = vld [vmem:[%s3294_s3 + $0x138] sm:$0xff]   ;;  %v46_v7 = vld [vmem:[%s3295_s0 + $0x10] sm:$0xff]  ;;  %v2522_v15 = vld [vmem:[%s3296_s2] sm:$0xff]  }
  0x18   :  { %2134 = vmatpush3.bf16.msra.mxu0 %v2470_v23  ;;  %v2515_v6 = vld [vmem:[%s3294_s3 + $0x1b8] sm:$0xff]   ;;  %v2906_v8 = vcombine.low %v46_v7, %v46_v7  ;;  %v2908_v9 = vcombine.high %v46_v7, %v46_v7  ;;  %v2523_v16 = vld [vmem:[%s3296_s2 + $0x80] sm:$0xff]   ;;  %v2524_v17 = vld [vmem:[%s3296_s2 + $0x48] sm:$0xff]  }
  0x19   :  { %2156 = vmatpush3.bf16.msra.mxu1 %v2471_v24  ;;  %2135 = vmatprep.subr.bf16.mxu0 %v2472_v25  ;;  %v47_v10 = vld [vmem:[%s3295_s0 + $0x18] sm:$0xff]  ;;  %v2525_v18 = vld [vmem:[%s3296_s2 + $0xc8] sm:$0xff]   ;;  %v2528_v21 = vld [vmem:[%s3296_s2 + $0x50] sm:$0xff]  }
  0x1a   :  { %2157 = vmatprep.subr.bf16.mxu1 %v2473_v26  ;;  %v2913_v11 = vcombine.low %v47_v10, %v47_v10  ;;  %v2915_v12 = vcombine.high %v47_v10, %v47_v10  ;;  %v2526_v19 = vld [vmem:[%s3296_s2 + $0x8] sm:$0xff]   ;;  %v2529_v22 = vld [vmem:[%s3296_s2 + $0xd0] sm:$0xff]   ;;  %v2532_v25 = vld [vmem:[%s3296_s2 + $0x58] sm:$0xff]  }
  0x1b   :  { %v2527_v20 = vld [vmem:[%s3296_s2 + $0x88] sm:$0xff]   ;;  %v2530_v23 = vld [vmem:[%s3296_s2 + $0x10] sm:$0xff]   ;;  %v2533_v26 = vld [vmem:[%s3296_s2 + $0xd8] sm:$0xff]  }
  0x1c   :  { %2136 = vmatpush3.bf16.msra.mxu0 %v2474_v27  ;;  %v2531_v24 = vld [vmem:[%s3296_s2 + $0x90] sm:$0xff]   ;;  %v2534_v27 = vld [vmem:[%s3296_s2 + $0x18] sm:$0xff]   ;;  %v2540_v33 = vld [vmem:[%s3296_s2 + $0x68] sm:$0xff]  }
  0x1d   :  { %2158 = vmatpush3.bf16.msra.mxu1 %v2475_v28  ;;  %2137 = vmatprep.subr.bf16.mxu0 %v2476_v29  ;;  %v2535_v28 = vld [vmem:[%s3296_s2 + $0x98] sm:$0xff]   ;;  %v2536_v29 = vld [vmem:[%s3296_s2 + $0x60] sm:$0xff]   ;;  %v2541_v34 = vld [vmem:[%s3296_s2 + $0xe8] sm:$0xff]  }
  0x1e   :  { %2159 = vmatprep.subr.bf16.mxu1 %v2477_v30  ;;  %v2537_v30 = vld [vmem:[%s3296_s2 + $0xe0] sm:$0xff]   ;;  %v2578_v7 = vld [vmem:[%s3296_s2 + $0x130] sm:$0xff]   ;;  %v2580_v10 = vld [vmem:[%s3296_s2 + $0x178] sm:$0xff]  }
  0x20   :  { %2138 = vmatpush3.bf16.msra.mxu0 %v2478_v31  ;;  %v2538_v31 = vld [vmem:[%s3296_s2 + $0x20] sm:$0xff]  }
  0x21   :  { %2160 = vmatpush3.bf16.msra.mxu1 %v2479_v32  ;;  %2167 = vmatprep.subr.bf16.mxu0 %v2484_v39  ;;  %v2539_v32 = vld [vmem:[%s3296_s2 + $0xa0] sm:$0xff]   ;;  %v2544_v39 = vld [vmem:[%s3296_s2 + $0x70] sm:$0xff]  }
  0x22   :  { %2189 = vmatprep.subr.bf16.mxu1 %v2485_v40  ;;  %v2545_v40 = vld [vmem:[%s3296_s2 + $0xf0] sm:$0xff]  }
  0x23   :  { %750 = vmatmul.mubr.bf16.vlgmr.msra.gmra.mrb[0].mxu0 %v2795_v35 }
  0x24   :  { %790 = vmatmul.mubr.bf16.vlgmr.msra.gmra.mrb[0].mxu1 %v2799_v37  ;;  %2168 = vmatpush3.bf16.msra.mxu0 %v2486_v41  ;;  %v2546_v41 = vld [vmem:[%s3296_s2 + $0x30] sm:$0xff]  }
  0x25   :  { %2190 = vmatpush3.bf16.msra.mxu1 %v2487_v42  ;;  %2169 = vmatprep.subr.bf16.mxu0 %v2488_v43  ;;  %v2547_v42 = vld [vmem:[%s3296_s2 + $0xb0] sm:$0xff]   ;;  %v2548_v43 = vld [vmem:[%s3296_s2 + $0x78] sm:$0xff]  }
  0x26   :  { %2191 = vmatprep.subr.bf16.mxu1 %v2489_v44  ;;  %829 = vmatprep.mubr.bf16.mxu0 %v2908_v9  ;;  %v2549_v44 = vld [vmem:[%s3296_s2 + $0xf8] sm:$0xff]  }
  0x27   :  { %869 = vmatprep.mubr.bf16.mxu1 %v2915_v12 }
  0x28   :  { %2170 = vmatpush3.bf16.msra.mxu0 %v2490_v45  ;;  %v2550_v45 = vld [vmem:[%s3296_s2 + $0x38] sm:$0xff]  }
  0x29   :  { %2192 = vmatpush3.bf16.msra.mxu1 %v2491_v46  ;;  %2171 = vmatprep.subr.bf16.mxu0 %v2492_v47  ;;  %v2551_v46 = vld [vmem:[%s3296_s2 + $0xb8] sm:$0xff]   ;;  %v2552_v47 = vld [vmem:[%s3296_s2 + $0x140] sm:$0xff]  }
  0x2a   :  { %2193 = vmatprep.subr.bf16.mxu1 %v2493_v48  ;;  %v2553_v48 = vld [vmem:[%s3296_s2 + $0x1c0] sm:$0xff]  }
  0x2c   :  { %2172 = vmatpush3.bf16.msra.mxu0 %v2494_v49  ;;  %v2554_v49 = vld [vmem:[%s3296_s2 + $0x100] sm:$0xff]  }
  0x2d   :  { %2194 = vmatpush3.bf16.msra.mxu1 %v2495_v50  ;;  %2173 = vmatprep.subr.bf16.mxu0 %v2496_v51  ;;  %v2555_v50 = vld [vmem:[%s3296_s2 + $0x180] sm:$0xff]   ;;  %v2556_v51 = vld [vmem:[%s3296_s2 + $0x148] sm:$0xff]  }
  0x2e   :  { %2195 = vmatprep.subr.bf16.mxu1 %v2497_v52  ;;  %v2557_v52 = vld [vmem:[%s3296_s2 + $0x1c8] sm:$0xff]  }
  0x30   :  { %2174 = vmatpush3.bf16.msra.mxu0 %v2498_v53  ;;  %v2560_v53 = vld [vmem:[%s3296_s2 + $0x150] sm:$0xff]  }
  0x31   :  { %2196 = vmatpush3.bf16.msra.mxu1 %v2499_v54  ;;  %2175 = vmatprep.subr.bf16.mxu0 %v2500_v55  ;;  %v2561_v54 = vld [vmem:[%s3296_s2 + $0x1d0] sm:$0xff]  }
  0x32   :  { %2197 = vmatprep.subr.bf16.mxu1 %v2501_v56  ;;  %v2562_v55 = vld [vmem:[%s3296_s2 + $0x110] sm:$0xff]  }
  0x33   :  { %v2563_v56 = vld [vmem:[%s3296_s2 + $0x190] sm:$0xff]  }
  0x34   :  { %2176 = vmatpush3.bf16.msra.mxu0 %v2502_v57  ;;  %v2564_v57 = vld [vmem:[%s3296_s2 + $0x158] sm:$0xff]  }
  0x35   :  { %2198 = vmatpush3.bf16.msra.mxu1 %v2503_v58  ;;  %2177 = vmatprep.subr.bf16.mxu0 %v2504_v59  ;;  %v2565_v58 = vld [vmem:[%s3296_s2 + $0x1d8] sm:$0xff]  }
  0x36   :  { %2199 = vmatprep.subr.bf16.mxu1 %v2505_v60  ;;  %v2566_v59 = vld [vmem:[%s3296_s2 + $0x118] sm:$0xff]  }
  0x37   :  { %v2567_v60 = vld [vmem:[%s3296_s2 + $0x198] sm:$0xff]  }
  0x38   :  { %2178 = vmatpush3.bf16.msra.mxu0 %v2506_v61  ;;  %v2568_v61 = vld [vmem:[%s3296_s2 + $0x160] sm:$0xff]  }
  0x39   :  { %2200 = vmatpush3.bf16.msra.mxu1 %v2507_v62  ;;  %2179 = vmatprep.subr.bf16.mxu0 %v2508_v63  ;;  %v2569_v62 = vld [vmem:[%s3296_s2 + $0x1e0] sm:$0xff]  }
  0x3a   :  { %2201 = vmatprep.subr.bf16.mxu1 %v2509_v0  ;;  %v2570_v63 = vld [vmem:[%s3296_s2 + $0x120] sm:$0xff]  }
  0x3b   :  { %v2571_v0 = vld [vmem:[%s3296_s2 + $0x1a0] sm:$0xff]  }
  0x3c   :  { %2180 = vmatpush3.bf16.msra.mxu0 %v2510_v1  ;;  %v2572_v1 = vld [vmem:[%s3296_s2 + $0x168] sm:$0xff]  }
  0x3d   :  { %2202 = vmatpush3.bf16.msra.mxu1 %v2511_v2  ;;  %2181 = vmatprep.subr.bf16.mxu0 %v2512_v3  ;;  %v2573_v2 = vld [vmem:[%s3296_s2 + $0x1e8] sm:$0xff]  }
  0x3e   :  { %2203 = vmatprep.subr.bf16.mxu1 %v2513_v4  ;;  %v2574_v3 = vld [vmem:[%s3296_s2 + $0x128] sm:$0xff]  }
  0x3f   :  { %v2575_v4 = vld [vmem:[%s3296_s2 + $0x1a8] sm:$0xff]  }
  0x40   :  { %2182 = vmatpush3.bf16.msra.mxu0 %v2514_v5  ;;  %v2576_v5 = vld [vmem:[%s3296_s2 + $0x170] sm:$0xff]  }
  0x41   :  { %2204 = vmatpush3.bf16.msra.mxu1 %v2515_v6  ;;  %2211 = vmatprep.subr.bf16.mxu0 %v2520_v13  ;;  %v2577_v6 = vld [vmem:[%s3296_s2 + $0x1f0] sm:$0xff]   ;;  %v2582_v13 = vld [vmem:[%s3296_s2 + $0x138] sm:$0xff]  }
  0x42   :  { %2233 = vmatprep.subr.bf16.mxu1 %v2521_v14  ;;  %v2583_v14 = vld [vmem:[%s3296_s2 + $0x1b8] sm:$0xff]  }
  0x43   :  { %830 = vmatmul.mubr.bf16.vlgmr.msra.gmra.mrb[4].mxu0 %v2906_v8 }
  0x44   :  { %870 = vmatmul.mubr.bf16.vlgmr.msra.gmra.mrb[4].mxu1 %v2913_v11  ;;  %2212 = vmatpush3.bf16.msra.mxu0 %v2522_v15  ;;  %v48_v15 = vld [vmem:[%s3297_s1] sm:$0xff] }
  0x45   :  { %2234 = vmatpush3.bf16.msra.mxu1 %v2523_v16  ;;  %1293 = vmatprep.mubr.bf16.mxu0 %v2797_v36  ;;  %v2542_v36 = vld [vmem:[%s3296_s2 + $0x28] sm:$0xff]   ;;  %v2621_v16 = vmov 0.0  }
  0x46   :  { %2213 = vmatprep.subr.bf16.mxu0 %v2524_v17  ;;  %1333 = vmatprep.mubr.bf16.mxu1 %v2801_v38  ;;  %v2543_v38 = vld [vmem:[%s3296_s2 + $0xa8] sm:$0xff]   ;;  %v2584_v17 = vld [vmem:[%s3298_s5] sm:$0xff]  }
  0x47   :  { %2235 = vmatprep.subr.bf16.mxu1 %v2525_v18  ;;  %1424 = vperm.xlu0 %2447, %v48_v15   ;;  %v2587_v18 = vld [vmem:[%s3298_s5 + $0x18] sm:$0xff]  }
  0x48   :  { %2214 = vmatpush3.bf16.msra.mxu0 %v2526_v19  ;;  %v2588_v19 = vld [vmem:[%s3298_s5 + $0x20] sm:$0xff]  }
  0x49   :  { %2236 = vmatpush3.bf16.msra.mxu1 %v2527_v20  ;;  %2215 = vmatprep.subr.bf16.mxu0 %v2528_v21  ;;  %v2589_v20 = vld [vmem:[%s3298_s5 + $0x28] sm:$0xff]   ;;  %v2590_v21 = vld [vmem:[%s3298_s5 + $0x30] sm:$0xff]  }
  0x4a   :  { %2237 = vmatprep.subr.bf16.mxu1 %v2529_v22  ;;  %v2591_v22 = vld [vmem:[%s3298_s5 + $0x38] sm:$0xff]  }
  0x4c   :  { %2216 = vmatpush3.bf16.msra.mxu0 %v2530_v23 }
  0x4d   :  { %2238 = vmatpush3.bf16.msra.mxu1 %v2531_v24  ;;  %2217 = vmatprep.subr.bf16.mxu0 %v2532_v25 }
  0x4e   :  { %2239 = vmatprep.subr.bf16.mxu1 %v2533_v26 }
  0x50   :  { %2218 = vmatpush3.bf16.msra.mxu0 %v2534_v27 }
  0x51   :  { %2240 = vmatpush3.bf16.msra.mxu1 %v2535_v28  ;;  %2219 = vmatprep.subr.bf16.mxu0 %v2536_v29 }
  0x52   :  { %2241 = vmatprep.subr.bf16.mxu1 %v2537_v30 }
  0x54   :  { %2220 = vmatpush3.bf16.msra.mxu0 %v2538_v31 }
  0x55   :  { %2242 = vmatpush3.bf16.msra.mxu1 %v2539_v32  ;;  %2221 = vmatprep.subr.bf16.mxu0 %v2540_v33 }
  0x56   :  { %2243 = vmatprep.subr.bf16.mxu1 %v2541_v34 }
  0x58   :  { %2222 = vmatpush3.bf16.msra.mxu0 %v2542_v36 }
  0x59   :  { %2244 = vmatpush3.bf16.msra.mxu1 %v2543_v38  ;;  %2223 = vmatprep.subr.bf16.mxu0 %v2544_v39 }
  0x5a   :  { %2245 = vmatprep.subr.bf16.mxu1 %v2545_v40 }
  0x5c   :  { %2224 = vmatpush3.bf16.msra.mxu0 %v2546_v41 }
  0x5d   :  { %2246 = vmatpush3.bf16.msra.mxu1 %v2547_v42  ;;  %2225 = vmatprep.subr.bf16.mxu0 %v2548_v43 }
  0x5e   :  { %2247 = vmatprep.subr.bf16.mxu1 %v2549_v44 }
  0x60   :  { %2226 = vmatpush3.bf16.msra.mxu0 %v2550_v45 }
  0x61   :  { %2248 = vmatpush3.bf16.msra.mxu1 %v2551_v46  ;;  %2255 = vmatprep.subr.bf16.mxu0 %v2552_v47 }
  0x62   :  { %2277 = vmatprep.subr.bf16.mxu1 %v2553_v48 }
  0x63   :  { %1294 = vmatmul.mubr.bf16.vlgmr.msra.gmra.mrb[8].mxu0 %v2795_v35  ;;  %v2558_v35 = vld [vmem:[%s3296_s2 + $0x108] sm:$0xff]  }
  0x64   :  { %1334 = vmatmul.mubr.bf16.vlgmr.msra.gmra.mrb[8].mxu1 %v2799_v37  ;;  %2256 = vmatpush3.bf16.msra.mxu0 %v2554_v49  ;;  %v2559_v37 = vld [vmem:[%s3296_s2 + $0x188] sm:$0xff]  }
  0x65   :  { %2278 = vmatpush3.bf16.msra.mxu1 %v2555_v50  ;;  %1373 = vmatprep.mubr.bf16.mxu0 %v2908_v9  ;;  %v2579_v9 = vld [vmem:[%s3296_s2 + $0x1b0] sm:$0xff]  }
  0x66   :  { %2257 = vmatprep.subr.bf16.mxu0 %v2556_v51  ;;  %1413 = vmatprep.mubr.bf16.mxu1 %v2915_v12  ;;  %v2581_v12 = vld [vmem:[%s3296_s2 + $0x1f8] sm:$0xff]  }
  0x67   :  { %2279 = vmatprep.subr.bf16.mxu1 %v2557_v52 }
  0x68   :  { %2258 = vmatpush3.bf16.msra.mxu0 %v2558_v35 }
  0x69   :  { %2280 = vmatpush3.bf16.msra.mxu1 %v2559_v37  ;;  %2259 = vmatprep.subr.bf16.mxu0 %v2560_v53 }
  0x6a   :  { %2281 = vmatprep.subr.bf16.mxu1 %v2561_v54 }
  0x6c   :  { %2260 = vmatpush3.bf16.msra.mxu0 %v2562_v55 }
  0x6d   :  { %2282 = vmatpush3.bf16.msra.mxu1 %v2563_v56  ;;  %2261 = vmatprep.subr.bf16.mxu0 %v2564_v57 }
  0x6e   :  { %2283 = vmatprep.subr.bf16.mxu1 %v2565_v58  ;;  %v2085_v58 = vld [vmem:[%s3300_s4] ss:$0 sm:$0xff] }
  0x70   :  { %2262 = vmatpush3.bf16.msra.mxu0 %v2566_v59 }
  0x71   :  { %2284 = vmatpush3.bf16.msra.mxu1 %v2567_v60  ;;  %2263 = vmatprep.subr.bf16.mxu0 %v2568_v61 }
  0x72   :  { %2285 = vmatprep.subr.bf16.mxu1 %v2569_v62 }
  0x74   :  { %2264 = vmatpush3.bf16.msra.mxu0 %v2570_v63 }
  0x75   :  { %2286 = vmatpush3.bf16.msra.mxu1 %v2571_v0  ;;  %2265 = vmatprep.subr.bf16.mxu0 %v2572_v1  ;;  %v2086_v0 = vld [vmem:[%s3300_s4 + $0x1] ss:$0 sm:$0xff] }
  0x76   :  { %2287 = vmatprep.subr.bf16.mxu1 %v2573_v2 }
  0x78   :  { %2266 = vmatpush3.bf16.msra.mxu0 %v2574_v3 }
  0x79   :  { %2288 = vmatpush3.bf16.msra.mxu1 %v2575_v4  ;;  %2267 = vmatprep.subr.bf16.mxu0 %v2576_v5 }
  0x7a   :  { %2289 = vmatprep.subr.bf16.mxu1 %v2577_v6 }
  0x7c   :  { %2268 = vmatpush3.bf16.msra.mxu0 %v2578_v7 }
  0x7d   :  { %2290 = vmatpush3.bf16.msra.mxu1 %v2579_v9  ;;  %2269 = vmatprep.subr.bf16.mxu0 %v2580_v10 }
  0x7e   :  { %2291 = vmatprep.subr.bf16.mxu1 %v2581_v12 }
  0x80   :  { %2270 = vmatpush3.bf16.msra.mxu0 %v2582_v13 }
  0x81   :  { %2292 = vmatpush3.bf16.msra.mxu1 %v2583_v14  ;;  %2344 = vmatprep.subr.bf16.mxu0 %v2621_v16 }
  0x82   :  { %2364 = vmatprep.subr.bf16.mxu1 %v2621_v16 }
  0x83   :  { %1374 = vmatmul.mubr.bf16.vlgmr.msra.gmra.mrb[12].mxu0 %v2906_v8  ;;  %v2585_v8 = vld [vmem:[%s3298_s5 + $0x8] sm:$0xff]  }
  0x84   :  { %1414 = vmatmul.mubr.bf16.vlgmr.msra.gmra.mrb[12].mxu1 %v2913_v11  ;;  %2345 = vmatpush3.bf16.msra.mxu0 %v2584_v17  ;;  %v2586_v11 = vld [vmem:[%s3298_s5 + $0x10] sm:$0xff]  }
  0x85   :  { %2365 = vmatpush3.bf16.msra.mxu1 %v2584_v17  ;;  %2346 = vmatprep.subr.bf16.mxu0 %v2621_v16 }
  0x86   :  { %2366 = vmatprep.subr.bf16.mxu1 %v2621_v16  ;;  %2380 = vmatprep.mubr.msk.bf16.mxu1 %vm2622_vm0, %v2621_v16 }
  0x87   :  { %2360 = vmatprep.mubr.msk.bf16.mxu0 %vm2622_vm0, %v2621_v16 }
  0x88   :  { %2347 = vmatpush3.bf16.msra.mxu0 %v2585_v8 }
  0x89   :  { %2367 = vmatpush3.bf16.msra.mxu1 %v2585_v8  ;;  %2348 = vmatprep.subr.bf16.mxu0 %v2621_v16 }
  0x8a   :  { %2368 = vmatprep.subr.bf16.mxu1 %v2621_v16 }
  0x8c   :  { %2349 = vmatpush3.bf16.msra.mxu0 %v2586_v11 }
  0x8d   :  { %2369 = vmatpush3.bf16.msra.mxu1 %v2586_v11  ;;  %2350 = vmatprep.subr.bf16.mxu0 %v2621_v16 }
  0x8e   :  { %2370 = vmatprep.subr.bf16.mxu1 %v2621_v16 }
  0x90   :  { %2351 = vmatpush3.bf16.msra.mxu0 %v2587_v18 }
  0x91   :  { %2371 = vmatpush3.bf16.msra.mxu1 %v2587_v18  ;;  %2352 = vmatprep.subr.bf16.mxu0 %v2621_v16 }
  0x92   :  { %2372 = vmatprep.subr.bf16.mxu1 %v2621_v16 }
  0x94   :  { %2353 = vmatpush3.bf16.msra.mxu0 %v2588_v19 }
  0x95   :  { %2373 = vmatpush3.bf16.msra.mxu1 %v2588_v19  ;;  %2354 = vmatprep.subr.bf16.mxu0 %v2621_v16 }
  0x96   :  { %2374 = vmatprep.subr.bf16.mxu1 %v2621_v16 }
  0x98   :  { %2355 = vmatpush3.bf16.msra.mxu0 %v2589_v20 }
  0x99   :  { %2375 = vmatpush3.bf16.msra.mxu1 %v2589_v20  ;;  %2356 = vmatprep.subr.bf16.mxu0 %v2621_v16  ;;  %v2592_v20 = vld [vmem:[%s3299_s6] sm:$0xff]  }
  0x9a   :  { %2376 = vmatprep.subr.bf16.mxu1 %v2621_v16 }
  0x9c   :  { %2357 = vmatpush3.bf16.msra.mxu0 %v2590_v21 }
  0x9d   :  { %2377 = vmatpush3.bf16.msra.mxu1 %v2590_v21  ;;  %2358 = vmatprep.subr.bf16.mxu0 %v2621_v16 }
  0x9e   :  { %2378 = vmatprep.subr.bf16.mxu1 %v2621_v16 }
  0xa0   :  { %2359 = vmatpush3.bf16.msra.mxu0 %v2591_v22 }
  0xa1   :  { %2379 = vmatpush3.bf16.msra.mxu1 %v2591_v22  ;;  %2384 = vmatprep.subr.bf16.mxu0 %v2621_v16  ;;  %v2593_v22 = vld [vmem:[%s3299_s6 + $0x8] sm:$0xff]  }
  0xa2   :  { %2404 = vmatprep.subr.bf16.mxu1 %v2621_v16 }
  0xc6   :  { %v1425_v59 = vpop.permute.xlu0 %1424 }
  0xc7   :  { %v1431_v61 = vmul.f32 %v2085_v58, %v1425_v59 }
  0xc9   :  { %v1437_v9 = vadd.f32 %v2086_v0, %v1431_v61 }
  0xf6   :  { %v2139_v23 = vpop.f32.mrb[0].mxu0 }
  0xf7   :  { %v2161_v24 = vpop.f32.mrb[0].mxu1  ;;  %v2140_v25 = vpop.f32.mrb[1].mxu0 }
  0xf8   :  { %v2162_v26 = vpop.f32.mrb[1].mxu1  ;;  %v2141_v27 = vadd.f32 %v2140_v25, %v2139_v23  ;;  %v2142_v29 = vpop.f32.mrb[2].mxu0  ;;  %v2594_v23 = vld [vmem:[%s3299_s6 + $0x10] sm:$0xff]   ;;  %v2596_v25 = vld [vmem:[%s3299_s6 + $0x20] sm:$0xff]  }
  0xf9   :  { %v2163_v28 = vadd.f32 %v2162_v26, %v2161_v24  ;;  %v2164_v30 = vpop.f32.mrb[2].mxu1  ;;  %v2143_v31 = vpop.f32.mrb[3].mxu0  ;;  %v2595_v24 = vld [vmem:[%s3299_s6 + $0x18] sm:$0xff]   ;;  %v2597_v26 = vld [vmem:[%s3299_s6 + $0x28] sm:$0xff]   ;;  %v2600_v29 = vld [vmem:[%s3301_s8] sm:$0xff]  }
  0xfa   :  { %v2165_v32 = vpop.f32.mrb[3].mxu1  ;;  %v2601_v30 = vld [vmem:[%s3301_s8 + $0x8] sm:$0xff]   ;;  %v2602_v31 = vld [vmem:[%s3301_s8 + $0x10] sm:$0xff]  }
  0xfb   :  { %v792_v33 = vadd.f32 %v2163_v28, %v2141_v27  ;;  %v2598_v27 = vld [vmem:[%s3299_s6 + $0x30] sm:$0xff]   ;;  %v2599_v28 = vld [vmem:[%s3299_s6 + $0x38] sm:$0xff]  }
  0xfc   :  { %v2603_v32 = vld [vmem:[%s3301_s8 + $0x18] sm:$0xff]  }
 0x116   :  { %v2183_v34 = vpop.f32.mrb[4].mxu0 }
 0x117   :  { %v2205_v36 = vpop.f32.mrb[4].mxu1  ;;  %v2184_v38 = vpop.f32.mrb[5].mxu0 }
 0x118   :  { %v2206_v39 = vpop.f32.mrb[5].mxu1  ;;  %v2185_v40 = vadd.f32 %v2184_v38, %v2183_v34  ;;  %v2186_v42 = vpop.f32.mrb[6].mxu0  ;;  %v2605_v34 = vld [vmem:[%s3301_s8 + $0x28] sm:$0xff]   ;;  %v2607_v38 = vld [vmem:[%s3301_s8 + $0x38] sm:$0xff]  }
 0x119   :  { %v2207_v41 = vadd.f32 %v2206_v39, %v2205_v36  ;;  %v2208_v43 = vpop.f32.mrb[6].mxu1  ;;  %v2187_v44 = vpop.f32.mrb[7].mxu0  ;;  %v2606_v36 = vld [vmem:[%s3301_s8 + $0x30] sm:$0xff]   ;;  %v2608_v39 = vld [vmem:[%s3302_s10] sm:$0xff]   ;;  %v2611_v42 = vld [vmem:[%s3302_s10 + $0x18] sm:$0xff]  }
 0x11a   :  { %v2209_v45 = vpop.f32.mrb[7].mxu1  ;;  %v832_v46 = vadd.f32 %v2185_v40, %v792_v33  ;;  %v2604_v33 = vld [vmem:[%s3301_s8 + $0x20] sm:$0xff]   ;;  %v2609_v40 = vld [vmem:[%s3302_s10 + $0x8] sm:$0xff]  }
 0x11b   :  { %v2612_v43 = vld [vmem:[%s3302_s10 + $0x20] sm:$0xff]   ;;  %v2613_v44 = vld [vmem:[%s3302_s10 + $0x28] sm:$0xff]  }
 0x11c   :  { %v872_v47 = vadd.f32 %v2207_v41, %v832_v46  ;;  %v2610_v41 = vld [vmem:[%s3302_s10 + $0x10] sm:$0xff]  }
 0x136   :  { %v2227_v48 = vpop.f32.mrb[8].mxu0 }
 0x137   :  { %v2249_v49 = vpop.f32.mrb[8].mxu1  ;;  %v2228_v50 = vpop.f32.mrb[9].mxu0 }
 0x138   :  { %v2229_v51 = vadd.f32 %v2228_v50, %v2227_v48  ;;  %v2250_v52 = vpop.f32.mrb[9].mxu1  ;;  %v2230_v35 = vpop.f32.mrb[10].mxu0 }
 0x139   :  { %v2251_v37 = vadd.f32 %v2250_v52, %v2249_v49  ;;  %v2252_v53 = vpop.f32.mrb[10].mxu1  ;;  %v2231_v54 = vpop.f32.mrb[11].mxu0 }
 0x13a   :  { %v1296_v55 = vadd.f32 %v2229_v51, %v872_v47  ;;  %v2253_v56 = vpop.f32.mrb[11].mxu1 }
 0x13c   :  { %v1336_v57 = vadd.f32 %v2251_v37, %v1296_v55  ;;  %v2103_v37 = vld [vmem:[%s3303_s7] ss:$0 sm:$0xff]  ;;  %v2104_v55 = vld [vmem:[%s3303_s7 + $0x1] ss:$0 sm:$0xff] }
 0x156   :  { %v2271_v60 = vpop.f32.mrb[12].mxu0 }
 0x157   :  { %v2293_v62 = vpop.f32.mrb[12].mxu1  ;;  %v2272_v63 = vpop.f32.mrb[13].mxu0 }
 0x158   :  { %v2273_v1 = vadd.f32 %v2272_v63, %v2271_v60  ;;  %v2294_v2 = vpop.f32.mrb[13].mxu1  ;;  %v2274_v3 = vpop.f32.mrb[14].mxu0 }
 0x159   :  { %v2295_v4 = vadd.f32 %v2294_v2, %v2293_v62  ;;  %v2296_v5 = vpop.f32.mrb[14].mxu1  ;;  %v2275_v6 = vpop.f32.mrb[15].mxu0  ;;  %v2614_v3 = vld [vmem:[%s3302_s10 + $0x30] sm:$0xff]  }
 0x15a   :  { %v1376_v7 = vadd.f32 %v2273_v1, %v1336_v57  ;;  %v2297_v10 = vpop.f32.mrb[15].mxu1  ;;  %v2105_v5 = vld [vmem:[%s3305_s9] ss:$0 sm:$0xff] }
 0x15c   :  { %v1416_v12 = vadd.f32 %v2295_v4, %v1376_v7  ;;  %v2615_v4 = vld [vmem:[%s3302_s10 + $0x38] sm:$0xff]  }
 0x15e   :  { %v1438_v13 = vadd.f32 %v1437_v9, %v1416_v12 }
 0x160   :  { %v1439_v14 = vmin.f32 %v1438_v13, 0.0 }
 0x162   :  { %v1440_v15 = vmul.f32 1.442695, %v1439_v14 }
 0x164   :  { %2616 = vpow2.f32 %v1440_v15 }
 0x16e   :  { %v2617_v17 = vpop.eup %2616 }
 0x16f   :  { %v1445_v8 = vpack.c.bf16 %v2617_v17, %v2617_v17  ;;  %v1442_v11 = vmul.f32 %v2617_v17, %v2617_v17 }
 0x171   :  { %2381 = vmatmul.mubr.bf16.vlgmr.msra.gmra.mrb[16].mxu1 %v1445_v8  ;;  %1443 = vadd.xlane.f32.xlu0 %v1442_v11  ;;  %v1446_v18 = vunpack.c.l.bf16 %v1445_v8 }
 0x172   :  { %2420 = vmatprep.mubr.msk.bf16.mxu1 %vm2622_vm0, %v2621_v16  ;;  %2405 = vmatpush3.bf16.msra.mxu1 %v2600_v29 }
 0x173   :  { %v1447_v19 = vsub.f32 %v2617_v17, %v1446_v18  ;;  %2406 = vmatprep.subr.bf16.mxu1 %v2621_v16 }
 0x175   :  { %v1448_v21 = vpack.c.bf16 %v1447_v19, %v1447_v19 }
 0x176   :  { %2407 = vmatpush3.bf16.msra.mxu1 %v2601_v30 }
 0x177   :  { %2361 = vmatmul.mubr.bf16.vlgmr.msra.gmra.mrb[16].mxu0 %v1448_v21  ;;  %2408 = vmatprep.subr.bf16.mxu1 %v2621_v16 }
 0x178   :  { %2385 = vmatpush3.bf16.msra.mxu0 %v2592_v20  ;;  %2400 = vmatprep.mubr.msk.bf16.mxu0 %vm2622_vm0, %v2621_v16 }
 0x179   :  { %2386 = vmatprep.subr.bf16.mxu0 %v2621_v16 }
 0x17a   :  { %2409 = vmatpush3.bf16.msra.mxu1 %v2602_v31 }
 0x17b   :  { %2410 = vmatprep.subr.bf16.mxu1 %v2621_v16 }
 0x17c   :  { %2387 = vmatpush3.bf16.msra.mxu0 %v2593_v22 }
 0x17d   :  { %2388 = vmatprep.subr.bf16.mxu0 %v2621_v16 }
 0x17e   :  { %2411 = vmatpush3.bf16.msra.mxu1 %v2603_v32 }
 0x17f   :  { %2412 = vmatprep.subr.bf16.mxu1 %v2621_v16 }
 0x180   :  { %2389 = vmatpush3.bf16.msra.mxu0 %v2594_v23 }
 0x181   :  { %2390 = vmatprep.subr.bf16.mxu0 %v2621_v16 }
 0x182   :  { %2413 = vmatpush3.bf16.msra.mxu1 %v2604_v33 }
 0x183   :  { %2414 = vmatprep.subr.bf16.mxu1 %v2621_v16 }
 0x184   :  { %2391 = vmatpush3.bf16.msra.mxu0 %v2595_v24 }
 0x185   :  { %2392 = vmatprep.subr.bf16.mxu0 %v2621_v16 }
 0x186   :  { %2415 = vmatpush3.bf16.msra.mxu1 %v2605_v34 }
 0x187   :  { %2416 = vmatprep.subr.bf16.mxu1 %v2621_v16 }
 0x188   :  { %2393 = vmatpush3.bf16.msra.mxu0 %v2596_v25 }
 0x189   :  { %2394 = vmatprep.subr.bf16.mxu0 %v2621_v16 }
 0x18a   :  { %2417 = vmatpush3.bf16.msra.mxu1 %v2606_v36 }
 0x18b   :  { %2418 = vmatprep.subr.bf16.mxu1 %v2621_v16 }
 0x18c   :  { %2395 = vmatpush3.bf16.msra.mxu0 %v2597_v26 }
 0x18d   :  { %2396 = vmatprep.subr.bf16.mxu0 %v2621_v16 }
 0x18e   :  { %2419 = vmatpush3.bf16.msra.mxu1 %v2607_v38 }
 0x190   :  { %2397 = vmatpush3.bf16.msra.mxu0 %v2598_v27 }
 0x191   :  { %2398 = vmatprep.subr.bf16.mxu0 %v2621_v16 }
 0x194   :  { %2399 = vmatpush3.bf16.msra.mxu0 %v2599_v28 }
 0x195   :  { %2424 = vmatprep.subr.bf16.mxu0 %v2621_v16 }
 0x197   :  { %2401 = vmatmul.mubr.bf16.vlgmr.msra.gmra.mrb[20].mxu0 %v1445_v8 }
 0x198   :  { %2440 = vmatprep.mubr.msk.bf16.mxu0 %vm2622_vm0, %v2621_v16  ;;  %2425 = vmatpush3.bf16.msra.mxu0 %v2608_v39 }
 0x199   :  { %2426 = vmatprep.subr.bf16.mxu0 %v2621_v16 }
 0x19c   :  { %2427 = vmatpush3.bf16.msra.mxu0 %v2609_v40 }
 0x19d   :  { %2428 = vmatprep.subr.bf16.mxu0 %v2621_v16 }
 0x1a0   :  { %2429 = vmatpush3.bf16.msra.mxu0 %v2610_v41 }
 0x1a1   :  { %2430 = vmatprep.subr.bf16.mxu0 %v2621_v16 }
 0x1a4   :  { %2431 = vmatpush3.bf16.msra.mxu0 %v2611_v42 }
 0x1a5   :  { %2432 = vmatprep.subr.bf16.mxu0 %v2621_v16 }
 0x1a8   :  { %2433 = vmatpush3.bf16.msra.mxu0 %v2612_v43 }
 0x1a9   :  { %2434 = vmatprep.subr.bf16.mxu0 %v2621_v16 }
 0x1ac   :  { %2435 = vmatpush3.bf16.msra.mxu0 %v2613_v44 }
 0x1ad   :  { %2436 = vmatprep.subr.bf16.mxu0 %v2621_v16 }
 0x1b0   :  { %2437 = vmatpush3.bf16.msra.mxu0 %v2614_v3 }
 0x1b1   :  { %2438 = vmatprep.subr.bf16.mxu0 %v2621_v16  ;;  %v2114_v16 = vld [vmem:[%s3306_s11] ss:$0 sm:$0xff] }
 0x1b4   :  { %2439 = vmatpush3.bf16.msra.mxu0 %v2615_v4 }
 0x1fe   :  { %v1444_v53 = vpop.xlane.xlu0 %1443 }
 0x1ff   :  { %v1703_v54 = vmul.f32 %v2103_v37, %v1444_v53 }
 0x201   :  { %v1709_v57 = vadd.f32 %v2104_v55, %v1703_v54 }
 0x244   :  { %v1587_v45 = vpop.f32.mrb[16].mxu1 }
 0x245   :  { %v2382_v46 = vpop.f32.mrb[17].mxu1 }
 0x246   :  { %v1590_v47 = vpop.f32.mrb[18].mxu1 }
 0x247   :  { %v2383_v48 = vpop.f32.mrb[19].mxu1 }
 0x24a   :  { %v1547_v49 = vpop.f32.mrb[16].mxu0 }
 0x24b   :  { %v1588_v50 = vadd.f32 %v1587_v45, %v1547_v49  ;;  %v2362_v51 = vpop.f32.mrb[17].mxu0 }
 0x24c   :  { %v1550_v52 = vpop.f32.mrb[18].mxu0 }
 0x24d   :  { %v2363_v35 = vpop.f32.mrb[19].mxu0 }
 0x26a   :  { %v1691_v56 = vpop.f32.mrb[20].mxu0 }
 0x26b   :  { %v1697_v58 = vadd.f32 %v1691_v56, %v1588_v50  ;;  %v2402_v59 = vpop.f32.mrb[21].mxu0 }
 0x26c   :  { %v1694_v60 = vpop.f32.mrb[22].mxu0 }
 0x26d   :  { %v1710_v61 = vadd.f32 %v1709_v57, %v1697_v58  ;;  %v2403_v62 = vpop.f32.mrb[23].mxu0 }
 0x26f   :  { %v1711_v63 = vmin.f32 %v1710_v61, 0.0 }
 0x271   :  { %v1712_v0 = vmul.f32 1.442695, %v1711_v63 }
 0x273   :  { %2618 = vpow2.f32 %v1712_v0 }
 0x27d   :  { %v2619_v1 = vpop.eup %2618 }
 0x27e   :  { %1939 = vst [vmem:[%s3304_s12] sm:$0xff] %v2619_v1  ;;  %v1714_v2 = vpack.c.bf16 %v2619_v1, %v2619_v1 }
 0x280   :  { %2421 = vmatmul.mubr.bf16.vlgmr.msra.gmra.mrb[20].mxu1 %v1714_v2 }
 0x353   :  { %v1820_v6 = vpop.f32.mrb[20].mxu1 }
 0x354   :  { %v1821_v7 = vadd.f32 %v2105_v5, %v1820_v6  ;;  %v2422_v9 = vpop.f32.mrb[21].mxu1 }
 0x355   :  { %v1823_v10 = vpop.f32.mrb[22].mxu1 }
 0x356   :  { %v1826_v12 = vmax.f32 %v1821_v7, 0.0  ;;  %v2423_v13 = vpop.f32.mrb[23].mxu1 }
 0x358   :  { %v1827_v14 = vpack.c.bf16 %v1826_v12, %v1826_v12 }
 0x35a   :  { %2441 = vmatmul.mubr.bf16.vlgmr.msra.gmra.mrb[24].mxu0 %v1827_v14 }
 0x42d   :  { %v1933_v15 = vpop.f32.mrb[24].mxu0 }
 0x42e   :  { %v1934_v17 = vadd.f32 %v2114_v16, %v1933_v15  ;;  %v2442_v8 = vpop.f32.mrb[25].mxu0 }
 0x42f   :  { %v1936_v11 = vpop.f32.mrb[26].mxu0 }
 0x430   :  { %1940 = vst [vmem:[%s3307_s13] sm:$0xff] %v1934_v17  ;;  %v2443_v18 = vpop.f32.mrb[27].mxu0 }

</bundles_post_ra>
